<compile_context>
chip_gen: v7x
topology: tpu7x:2x2x1
jax: 0.10.0
libtpu: 0.0.40
codegen_flags: <defaults>
</compile_context>

<pallas_src>
import functools

import jax
import jax.numpy as jnp
from jax.experimental import pallas as pl
from jax.experimental.pallas import tpu as pltpu


def _round_up(n, m):
    return ((n + m - 1) // m) * m


def _cdiv(a, b):
    return (a + b - 1) // b


# ----------------------------------------------------------------------------
# Fused kernel: relu(x @ Mconv + cb) @ W1 + b1 -> relu -> @ W2 + b2
#   x:  (BT, KP)        Mconv: (KP, W*32)   cb: (1, W*32)
#   W1: (W*32, HP)      b1: (1, HP)
#   W2: (HP, CP)        b2: (1, CP)         out: (BT, CP)
# ----------------------------------------------------------------------------
def _fused_kernel(x_ref, mconv_ref, cb_ref, w1_ref, b1_ref, w2_ref, b2_ref,
                  o_ref):
    # Conv-as-matmul + bias + ReLU (MXU in compute dtype, accumulate in f32).
    conv = jnp.dot(x_ref[...], mconv_ref[...],
                   preferred_element_type=jnp.float32)
    conv = jnp.maximum(conv + cb_ref[...], 0.0)               # (BT, W*32) f32

    # fc1 + ReLU (hidden padded to 128 lanes; padded cols are zero).
    h = jnp.dot(conv.astype(w1_ref.dtype), w1_ref[...],
                preferred_element_type=jnp.float32)
    h = jnp.maximum(h + b1_ref[...], 0.0)                     # (BT, HP) f32

    # fc2 (class dim padded to 128 lanes; padded cols are zero).
    y = jnp.dot(h.astype(w2_ref.dtype), w2_ref[...],
                preferred_element_type=jnp.float32)
    o_ref[...] = (y + b2_ref[...]).astype(o_ref.dtype)        # (BT, CP)


# ----------------------------------------------------------------------------
# One-time weight preparation (trace-time constants; tiny transforms).
# ----------------------------------------------------------------------------
def prepare_params(params, *, k, feature, class_num,
                   compute_dtype=jnp.bfloat16):
    W = feature
    conv_w = params["conv_w"].astype(jnp.float32)   # (32, 1, k, 3)
    conv_b = params["conv_b"].astype(jnp.float32)   # (32,)
    fc1_w = params["fc1_w"].astype(jnp.float32)     # (64, 32*W), PyTorch (out,in)
    fc1_b = params["fc1_b"].astype(jnp.float32)     # (64,)
    fc2_w = params["fc2_w"].astype(jnp.float32)     # (class_num, 64)
    fc2_b = params["fc2_b"].astype(jnp.float32)     # (class_num,)

    # Banded conv matrix over VALID taps only (no width zero-pad of x needed):
    #   Mconv[kh*W + w', w*32 + c] = sum_kw conv_w[c,0,kh,kw] * I[w' == w+kw-1]
    # Taps referencing w' = -1 or w' = W simply have no row, which is exactly
    # what Conv2d's zero padding (0,1) contributes.
    cw = conv_w.reshape(32, k, 3)                                    # (c, kh, kw)
    shift = jnp.stack([jnp.eye(W, W, k=1 - kw, dtype=jnp.float32)
                       for kw in range(3)])                          # (kw, w', w)
    mconv = jnp.einsum("chq,qvw->hvwc", cw, shift)                   # (kh, w', w, c)
    mconv = mconv.reshape(k * W, W * 32)
    # Pad the contraction dim to a lane-dense multiple of 128 (unmasked vld).
    KP = _round_up(k * W, 128)
    mconv = jnp.pad(mconv, ((0, KP - k * W), (0, 0)))
    conv_b_flat = jnp.tile(conv_b, W).reshape(1, W * 32)             # [w*32+c] -> b[c]

    # fc1: permute input index c*W + w -> w*32 + c (kills activation transpose),
    # pad hidden to 128 lanes (padded cols zero; ReLU keeps them zero).
    H = fc1_w.shape[0]                                               # 64
    HP = max(128, _round_up(H, 128))
    fc1_perm = fc1_w.T.reshape(32, W, H).transpose(1, 0, 2).reshape(W * 32, H)
    fc1_perm = jnp.pad(fc1_perm, ((0, 0), (0, HP - H)))
    fc1_b_row = jnp.pad(fc1_b, (0, HP - H)).reshape(1, HP)

    # fc2: pad class dim to a multiple of 128 (lane-dense output store);
    # padded hidden rows / class cols are zero -> no effect on real outputs.
    CP = max(128, _round_up(class_num, 128))
    fc2_pad = jnp.zeros((HP, CP), jnp.float32).at[:H, :class_num].set(fc2_w.T)
    fc2_b_pad = jnp.zeros((1, CP), jnp.float32).at[0, :class_num].set(fc2_b)

    return {
        "mconv": mconv.astype(compute_dtype),
        "conv_b_flat": conv_b_flat,                 # biases stay f32 (epilogue)
        "fc1_w_perm": fc1_perm.astype(compute_dtype),
        "fc1_b_row": fc1_b_row,
        "fc2_w_pad": fc2_pad.astype(compute_dtype),
        "fc2_b_pad": fc2_b_pad,
    }


# ----------------------------------------------------------------------------
# Forward pass
# ----------------------------------------------------------------------------
def classification_cnn2_forward(x, prepared, *, k, feature, class_num,
                                block_b=256, single_buffer_weights=True):
    """x: (B, 1, k, feature) NCHW float32 (cast to compute dtype here)."""
    B = x.shape[0]
    W = feature
    KW = k * W
    F = W * 32
    KP = prepared["mconv"].shape[0]
    HP = prepared["fc1_w_perm"].shape[1]
    CP = prepared["fc2_w_pad"].shape[1]
    cdt = prepared["mconv"].dtype
    xbytes = jnp.dtype(cdt).itemsize
    wbytes = xbytes

    # Flatten x to (B, k*W): a contiguous reshape (no padded-width HBM copy),
    # cast to the MXU compute dtype.
    xflat = x.reshape(B, KW).astype(cdt)

    # --- VMEM-aware batch tiling -------------------------------------------
    weight_bytes = ((KP * F + F * HP + HP * CP) * wbytes
                    + (F + HP + CP) * 4)

    def vmem_est(bt):
        act = 2 * bt * KP * xbytes + 2 * bt * CP * 4      # double-buffered x / out
        inter = bt * F * 4 + bt * HP * 4                  # f32 conv / hidden values
        return weight_bytes + act + inter

    # Aim for >= 4 batch tiles so the "parallel" axis keeps both v7x TCs busy,
    # then shrink BT if the footprint gets tight (v7x 64 MiB VMEM, v5e spills).
    BT = min(block_b, max(8, _round_up(_cdiv(_round_up(B, 8), 4), 8)))
    while BT > 8 and vmem_est(BT) > (20 << 20):
        BT = max(8, _round_up(BT // 2, 8))
    Bp = _round_up(B, BT)

    pads = ((0, Bp - B), (0, KP - KW))
    if any(p != (0, 0) for p in pads):
        xflat = jnp.pad(xflat, pads)

    # Invariant weight blocks: fetched once; single-buffer them to save VMEM.
    def weight_spec(shape):
        idx = lambda i: (0, 0)
        if single_buffer_weights:
            try:
                return pl.BlockSpec(shape, idx, pipeline_mode=pl.Buffered(1))
            except Exception:
                pass
        return pl.BlockSpec(shape, idx)

    flops = 2 * Bp * (KP * F + F * HP + HP * CP)
    bytes_accessed = Bp * KP * xbytes + Bp * CP * 4 + weight_bytes
    vmem_limit = int(min(48 << 20, max(32 << 20, 2 * vmem_est(BT))))

    out = pl.pallas_call(
        _fused_kernel,
        out_shape=jax.ShapeDtypeStruct((Bp, CP), jnp.float32),
        grid=(Bp // BT,),
        in_specs=[
            pl.BlockSpec((BT, KP), lambda i: (i, 0)),     # x tile (pipelined)
            weight_spec((KP, F)),                         # conv matrix
            weight_spec((1, F)),                          # conv bias
            weight_spec((F, HP)),                         # fc1 weight
            weight_spec((1, HP)),                         # fc1 bias
            weight_spec((HP, CP)),                        # fc2 weight
            weight_spec((1, CP)),                         # fc2 bias
        ],
        out_specs=pl.BlockSpec((BT, CP), lambda i: (i, 0)),
        compiler_params=pltpu.CompilerParams(
            dimension_semantics=("parallel",),            # v7x: shard tiles over 2 TCs
            vmem_limit_bytes=vmem_limit),
        cost_estimate=pl.CostEstimate(
            flops=flops, transcendentals=0, bytes_accessed=bytes_accessed),
    )(xflat, prepared["mconv"], prepared["conv_b_flat"],
      prepared["fc1_w_perm"], prepared["fc1_b_row"],
      prepared["fc2_w_pad"], prepared["fc2_b_pad"])

    return out[:B, :class_num]


def init_params(key, *, k, feature, class_num):
    ks = jax.random.split(key, 6)
    scale = 0.1
    return {
        "conv_w": scale * jax.random.normal(ks[0], (32, 1, k, 3), jnp.float32),
        "conv_b": scale * jax.random.normal(ks[1], (32,), jnp.float32),
        "fc1_w": scale * jax.random.normal(ks[2], (64, 32 * feature), jnp.float32),
        "fc1_b": scale * jax.random.normal(ks[3], (64,), jnp.float32),
        "fc2_w": scale * jax.random.normal(ks[4], (class_num, 64), jnp.float32),
        "fc2_b": scale * jax.random.normal(ks[5], (class_num,), jnp.float32),
    }


def _reference_forward(x, params, *, k, feature, class_num):
    """Pure-JAX reference mirroring the PyTorch module (for validation)."""
    conv = jax.lax.conv_general_dilated(
        x, params["conv_w"],
        window_strides=(1, 1),
        padding=((0, 0), (1, 1)),
        dimension_numbers=("NCHW", "OIHW", "NCHW"),
    ) + params["conv_b"].reshape(1, 32, 1, 1)
    conv = jnp.maximum(conv, 0.0)                       # (B, 32, 1, feature)
    flat = conv.reshape(conv.shape[0], -1)              # (B, 32*feature)
    h = jnp.maximum(flat @ params["fc1_w"].T + params["fc1_b"], 0.0)
    return h @ params["fc2_w"].T + params["fc2_b"]


if __name__ == "__main__":
    B, k, feature, class_num = 2, 4, 16, 8

    key = jax.random.PRNGKey(0)
    kx, kp = jax.random.split(key)
    x = jax.random.normal(kx, (B, 1, k, feature), jnp.float32)
    params = init_params(kp, k=k, feature=feature, class_num=class_num)

    ref = _reference_forward(x, params, k=k, feature=feature,
                             class_num=class_num)

    def run(compute_dtype, single_buffer):
        prep = prepare_params(params, k=k, feature=feature,
                              class_num=class_num, compute_dtype=compute_dtype)
        fwd = jax.jit(functools.partial(
            classification_cnn2_forward, k=k, feature=feature,
            class_num=class_num, single_buffer_weights=single_buffer))
        return jax.block_until_ready(fwd(x, prep))

    try:
        out_bf16 = run(jnp.bfloat16, True)   # fast path: bf16 MXU, f32 epilogue
        out_f32 = run(jnp.float32, True)     # exact-validation path
    except Exception:
        # Fallback if this JAX build rejects single-buffered (pl.Buffered(1)) specs.
        out_bf16 = run(jnp.bfloat16, False)
        out_f32 = run(jnp.float32, False)

    assert out_f32.shape == (B, class_num)
    assert out_bf16.shape == (B, class_num)
    assert jnp.allclose(out_f32, ref, atol=1e-4, rtol=1e-4), \
        "f32 path mismatch vs reference"
    assert jnp.allclose(out_bf16, ref, atol=5e-2, rtol=5e-2), \
        "bf16 path mismatch vs reference"

    print("KERNEL_OK")
</pallas_src>

<mosaic_0001>
module attributes {stable_mosaic.version = 11 : i64} {
  func.func @_fused_kernel(%arg0: i32, %arg1: memref<8x128xbf16, #tpu.memory_space<vmem>>, %arg2: memref<128x512xbf16, #tpu.memory_space<vmem>>, %arg3: memref<1x512xf32, #tpu.memory_space<vmem>>, %arg4: memref<512x128xbf16, #tpu.memory_space<vmem>>, %arg5: memref<1x128xf32, #tpu.memory_space<vmem>>, %arg6: memref<128x128xbf16, #tpu.memory_space<vmem>>, %arg7: memref<1x128xf32, #tpu.memory_space<vmem>>, %arg8: memref<8x128xf32, #tpu.memory_space<vmem>>) attributes {dimension_semantics = [#tpu.dimension_semantics<parallel>], iteration_bounds = array<i64: 1>, scalar_prefetch = 0 : i64, scratch_operands = 0 : i64, tpu.core_type = #tpu.core_type<tc>, window_params = [{transform_indices = @transform_0, window_bounds = array<i64: 8, 128>}, {pipeline_mode = #tpu.pipeline_mode<synchronous>, transform_indices = @transform_1, window_bounds = array<i64: 128, 512>}, {pipeline_mode = #tpu.pipeline_mode<synchronous>, transform_indices = @transform_2, window_bounds = array<i64: 1, 512>}, {pipeline_mode = #tpu.pipeline_mode<synchronous>, transform_indices = @transform_3, window_bounds = array<i64: 512, 128>}, {pipeline_mode = #tpu.pipeline_mode<synchronous>, transform_indices = @transform_4, window_bounds = array<i64: 1, 128>}, {pipeline_mode = #tpu.pipeline_mode<synchronous>, transform_indices = @transform_5, window_bounds = array<i64: 128, 128>}, {pipeline_mode = #tpu.pipeline_mode<synchronous>, transform_indices = @transform_6, window_bounds = array<i64: 1, 128>}, {transform_indices = @transform_7, window_bounds = array<i64: 8, 128>}]} {
    %c0 = arith.constant 0 : index
    %c0_0 = arith.constant 0 : index
    %0 = vector.load %arg1[%c0, %c0_0] : memref<8x128xbf16, #tpu.memory_space<vmem>>, vector<8x128xbf16>
    %c0_1 = arith.constant 0 : index
    %c0_2 = arith.constant 0 : index
    %1 = vector.load %arg2[%c0_1, %c0_2] : memref<128x512xbf16, #tpu.memory_space<vmem>>, vector<128x512xbf16>
    %cst = arith.constant dense<0.000000e+00> : vector<8x512xf32>
    %2 = tpu.matmul %0, %1, %cst {dimension_numbers = #tpu.dot_dimension_numbers<[1], [0], [0], [1], [0, 0, 1, 1], [], []>} : vector<8x128xbf16>, vector<128x512xbf16>, vector<8x512xf32> -> vector<8x512xf32>
    %c0_3 = arith.constant 0 : index
    %c0_4 = arith.constant 0 : index
    %3 = vector.load %arg3[%c0_3, %c0_4] : memref<1x512xf32, #tpu.memory_space<vmem>>, vector<1x512xf32>
    %4 = vector.broadcast %3 : vector<1x512xf32> to vector<8x512xf32>
    %5 = arith.addf %2, %4 : vector<8x512xf32>
    %cst_5 = arith.constant 0.000000e+00 : f32
    %6 = vector.broadcast %cst_5 : f32 to vector<8x512xf32>
    %7 = arith.maximumf %5, %6 : vector<8x512xf32>
    %8 = arith.truncf %7 : vector<8x512xf32> to vector<8x512xbf16>
    %c0_6 = arith.constant 0 : index
    %c0_7 = arith.constant 0 : index
    %9 = vector.load %arg4[%c0_6, %c0_7] : memref<512x128xbf16, #tpu.memory_space<vmem>>, vector<512x128xbf16>
    %cst_8 = arith.constant dense<0.000000e+00> : vector<8x128xf32>
    %10 = tpu.matmul %8, %9, %cst_8 {dimension_numbers = #tpu.dot_dimension_numbers<[1], [0], [0], [1], [0, 0, 1, 1], [], []>} : vector<8x512xbf16>, vector<512x128xbf16>, vector<8x128xf32> -> vector<8x128xf32>
    %c0_9 = arith.constant 0 : index
    %c0_10 = arith.constant 0 : index
    %11 = vector.load %arg5[%c0_9, %c0_10] : memref<1x128xf32, #tpu.memory_space<vmem>>, vector<1x128xf32>
    %12 = vector.broadcast %11 : vector<1x128xf32> to vector<8x128xf32>
    %13 = arith.addf %10, %12 : vector<8x128xf32>
    %cst_11 = arith.constant 0.000000e+00 : f32
    %14 = vector.broadcast %cst_11 : f32 to vector<8x128xf32>
    %15 = arith.maximumf %13, %14 : vector<8x128xf32>
    %16 = arith.truncf %15 : vector<8x128xf32> to vector<8x128xbf16>
    %c0_12 = arith.constant 0 : index
    %c0_13 = arith.constant 0 : index
    %17 = vector.load %arg6[%c0_12, %c0_13] : memref<128x128xbf16, #tpu.memory_space<vmem>>, vector<128x128xbf16>
    %cst_14 = arith.constant dense<0.000000e+00> : vector<8x128xf32>
    %18 = tpu.matmul %16, %17, %cst_14 {dimension_numbers = #tpu.dot_dimension_numbers<[1], [0], [0], [1], [0, 0, 1, 1], [], []>} : vector<8x128xbf16>, vector<128x128xbf16>, vector<8x128xf32> -> vector<8x128xf32>
    %c0_15 = arith.constant 0 : index
    %c0_16 = arith.constant 0 : index
    %19 = vector.load %arg7[%c0_15, %c0_16] : memref<1x128xf32, #tpu.memory_space<vmem>>, vector<1x128xf32>
    %20 = vector.broadcast %19 : vector<1x128xf32> to vector<8x128xf32>
    %21 = arith.addf %18, %20 : vector<8x128xf32>
    %c0_17 = arith.constant 0 : index
    %c0_18 = arith.constant 0 : index
    %22 = vector.load %arg8[%c0_17, %c0_18] : memref<8x128xf32, #tpu.memory_space<vmem>>, vector<8x128xf32>
    tpu.vector_store %arg8[%c0_17, %c0_18], %21 {strides = array<i32>} : memref<8x128xf32, #tpu.memory_space<vmem>>, vector<8x128xf32>,
    return
  }
  func.func @transform_0(%arg0: i32) -> (i32, i32) {
    %c0_i32 = arith.constant 0 : i32
    %c0_i32_0 = arith.constant 0 : i32
    return %arg0, %c0_i32 : i32, i32
  }
  func.func @transform_1(%arg0: i32) -> (i32, i32) {
    %c0_i32 = arith.constant 0 : i32
    %c0_i32_0 = arith.constant 0 : i32
    %c0_i32_1 = arith.constant 0 : i32
    return %c0_i32, %c0_i32_0 : i32, i32
  }
  func.func @transform_2(%arg0: i32) -> (i32, i32) {
    %c0_i32 = arith.constant 0 : i32
    %c0_i32_0 = arith.constant 0 : i32
    %c0_i32_1 = arith.constant 0 : i32
    return %c0_i32, %c0_i32_0 : i32, i32
  }
  func.func @transform_3(%arg0: i32) -> (i32, i32) {
    %c0_i32 = arith.constant 0 : i32
    %c0_i32_0 = arith.constant 0 : i32
    %c0_i32_1 = arith.constant 0 : i32
    return %c0_i32, %c0_i32_0 : i32, i32
  }
  func.func @transform_4(%arg0: i32) -> (i32, i32) {
    %c0_i32 = arith.constant 0 : i32
    %c0_i32_0 = arith.constant 0 : i32
    %c0_i32_1 = arith.constant 0 : i32
    return %c0_i32, %c0_i32_0 : i32, i32
  }
  func.func @transform_5(%arg0: i32) -> (i32, i32) {
    %c0_i32 = arith.constant 0 : i32
    %c0_i32_0 = arith.constant 0 : i32
    %c0_i32_1 = arith.constant 0 : i32
    return %c0_i32, %c0_i32_0 : i32, i32
  }
  func.func @transform_6(%arg0: i32) -> (i32, i32) {
    %c0_i32 = arith.constant 0 : i32
    %c0_i32_0 = arith.constant 0 : i32
    %c0_i32_1 = arith.constant 0 : i32
    return %c0_i32, %c0_i32_0 : i32, i32
  }
  func.func @transform_7(%arg0: i32) -> (i32, i32) {
    %c0_i32 = arith.constant 0 : i32
    %c0_i32_0 = arith.constant 0 : i32
    return %arg0, %c0_i32 : i32, i32
  }
}

module attributes {stable_mosaic.version = 11 : i64} {
  func.func @_fused_kernel(%arg0: i32, %arg1: memref<8x128xbf16, #tpu.memory_space<vmem>>, %arg2: memref<128x512xbf16, #tpu.memory_space<vmem>>, %arg3: memref<1x512xf32, #tpu.memory_space<vmem>>, %arg4: memref<512x128xbf16, #tpu.memory_space<vmem>>, %arg5: memref<1x128xf32, #tpu.memory_space<vmem>>, %arg6: memref<128x128xbf16, #tpu.memory_space<vmem>>, %arg7: memref<1x128xf32, #tpu.memory_space<vmem>>, %arg8: memref<8x128xf32, #tpu.memory_space<vmem>>) attributes {dimension_semantics = [#tpu.dimension_semantics<parallel>], iteration_bounds = array<i64: 1>, scalar_prefetch = 0 : i64, scratch_operands = 0 : i64, tpu.core_type = #tpu.core_type<tc>, window_params = [{transform_indices = @transform_0, window_bounds = array<i64: 8, 128>}, {pipeline_mode = #tpu.pipeline_mode<synchronous>, transform_indices = @transform_1, window_bounds = array<i64: 128, 512>}, {pipeline_mode = #tpu.pipeline_mode<synchronous>, transform_indices = @transform_2, window_bounds = array<i64: 1, 512>}, {pipeline_mode = #tpu.pipeline_mode<synchronous>, transform_indices = @transform_3, window_bounds = array<i64: 512, 128>}, {pipeline_mode = #tpu.pipeline_mode<synchronous>, transform_indices = @transform_4, window_bounds = array<i64: 1, 128>}, {pipeline_mode = #tpu.pipeline_mode<synchronous>, transform_indices = @transform_5, window_bounds = array<i64: 128, 128>}, {pipeline_mode = #tpu.pipeline_mode<synchronous>, transform_indices = @transform_6, window_bounds = array<i64: 1, 128>}, {transform_indices = @transform_7, window_bounds = array<i64: 8, 128>}]} {
    %c0 = arith.constant 0 : index
    %c0_0 = arith.constant 0 : index
    %0 = vector.load %arg1[%c0, %c0_0] : memref<8x128xbf16, #tpu.memory_space<vmem>>, vector<8x128xbf16>
    %c0_1 = arith.constant 0 : index
    %c0_2 = arith.constant 0 : index
    %1 = vector.load %arg2[%c0_1, %c0_2] : memref<128x512xbf16, #tpu.memory_space<vmem>>, vector<128x512xbf16>
    %cst = arith.constant dense<0.000000e+00> : vector<8x512xf32>
    %2 = tpu.matmul %0, %1, %cst {dimension_numbers = #tpu.dot_dimension_numbers<[1], [0], [0], [1], [0, 0, 1, 1], [], []>} : vector<8x128xbf16>, vector<128x512xbf16>, vector<8x512xf32> -> vector<8x512xf32>
    %c0_3 = arith.constant 0 : index
    %c0_4 = arith.constant 0 : index
    %3 = vector.load %arg3[%c0_3, %c0_4] : memref<1x512xf32, #tpu.memory_space<vmem>>, vector<1x512xf32>
    %4 = vector.broadcast %3 : vector<1x512xf32> to vector<8x512xf32>
    %5 = arith.addf %2, %4 : vector<8x512xf32>
    %cst_5 = arith.constant 0.000000e+00 : f32
    %6 = vector.broadcast %cst_5 : f32 to vector<8x512xf32>
    %7 = arith.maximumf %5, %6 : vector<8x512xf32>
    %8 = arith.truncf %7 : vector<8x512xf32> to vector<8x512xbf16>
    %c0_6 = arith.constant 0 : index
    %c0_7 = arith.constant 0 : index
    %9 = vector.load %arg4[%c0_6, %c0_7] : memref<512x128xbf16, #tpu.memory_space<vmem>>, vector<512x128xbf16>
    %cst_8 = arith.constant dense<0.000000e+00> : vector<8x128xf32>
    %10 = tpu.matmul %8, %9, %cst_8 {dimension_numbers = #tpu.dot_dimension_numbers<[1], [0], [0], [1], [0, 0, 1, 1], [], []>} : vector<8x512xbf16>, vector<512x128xbf16>, vector<8x128xf32> -> vector<8x128xf32>
    %c0_9 = arith.constant 0 : index
    %c0_10 = arith.constant 0 : index
    %11 = vector.load %arg5[%c0_9, %c0_10] : memref<1x128xf32, #tpu.memory_space<vmem>>, vector<1x128xf32>
    %12 = vector.broadcast %11 : vector<1x128xf32> to vector<8x128xf32>
    %13 = arith.addf %10, %12 : vector<8x128xf32>
    %cst_11 = arith.constant 0.000000e+00 : f32
    %14 = vector.broadcast %cst_11 : f32 to vector<8x128xf32>
    %15 = arith.maximumf %13, %14 : vector<8x128xf32>
    %16 = arith.truncf %15 : vector<8x128xf32> to vector<8x128xbf16>
    %c0_12 = arith.constant 0 : index
    %c0_13 = arith.constant 0 : index
    %17 = vector.load %arg6[%c0_12, %c0_13] : memref<128x128xbf16, #tpu.memory_space<vmem>>, vector<128x128xbf16>
    %cst_14 = arith.constant dense<0.000000e+00> : vector<8x128xf32>
    %18 = tpu.matmul %16, %17, %cst_14 {dimension_numbers = #tpu.dot_dimension_numbers<[1], [0], [0], [1], [0, 0, 1, 1], [], []>} : vector<8x128xbf16>, vector<128x128xbf16>, vector<8x128xf32> -> vector<8x128xf32>
    %c0_15 = arith.constant 0 : index
    %c0_16 = arith.constant 0 : index
    %19 = vector.load %arg7[%c0_15, %c0_16] : memref<1x128xf32, #tpu.memory_space<vmem>>, vector<1x128xf32>
    %20 = vector.broadcast %19 : vector<1x128xf32> to vector<8x128xf32>
    %21 = arith.addf %18, %20 : vector<8x128xf32>
    %c0_17 = arith.constant 0 : index
    %c0_18 = arith.constant 0 : index
    %22 = vector.load %arg8[%c0_17, %c0_18] : memref<8x128xf32, #tpu.memory_space<vmem>>, vector<8x128xf32>
    tpu.vector_store %arg8[%c0_17, %c0_18], %21 {strides = array<i32>} : memref<8x128xf32, #tpu.memory_space<vmem>>, vector<8x128xf32>,
    return
  }
  func.func @transform_0(%arg0: i32) -> (i32, i32) {
    %c0_i32 = arith.constant 0 : i32
    %c0_i32_0 = arith.constant 0 : i32
    return %arg0, %c0_i32 : i32, i32
  }
  func.func @transform_1(%arg0: i32) -> (i32, i32) {
    %c0_i32 = arith.constant 0 : i32
    %c0_i32_0 = arith.constant 0 : i32
    %c0_i32_1 = arith.constant 0 : i32
    return %c0_i32, %c0_i32_0 : i32, i32
  }
  func.func @transform_2(%arg0: i32) -> (i32, i32) {
    %c0_i32 = arith.constant 0 : i32
    %c0_i32_0 = arith.constant 0 : i32
    %c0_i32_1 = arith.constant 0 : i32
    return %c0_i32, %c0_i32_0 : i32, i32
  }
  func.func @transform_3(%arg0: i32) -> (i32, i32) {
    %c0_i32 = arith.constant 0 : i32
    %c0_i32_0 = arith.constant 0 : i32
    %c0_i32_1 = arith.constant 0 : i32
    return %c0_i32, %c0_i32_0 : i32, i32
  }
  func.func @transform_4(%arg0: i32) -> (i32, i32) {
    %c0_i32 = arith.constant 0 : i32
    %c0_i32_0 = arith.constant 0 : i32
    %c0_i32_1 = arith.constant 0 : i32
    return %c0_i32, %c0_i32_0 : i32, i32
  }
  func.func @transform_5(%arg0: i32) -> (i32, i32) {
    %c0_i32 = arith.constant 0 : i32
    %c0_i32_0 = arith.constant 0 : i32
    %c0_i32_1 = arith.constant 0 : i32
    return %c0_i32, %c0_i32_0 : i32, i32
  }
  func.func @transform_6(%arg0: i32) -> (i32, i32) {
    %c0_i32 = arith.constant 0 : i32
    %c0_i32_0 = arith.constant 0 : i32
    %c0_i32_1 = arith.constant 0 : i32
    return %c0_i32, %c0_i32_0 : i32, i32
  }
  func.func @transform_7(%arg0: i32) -> (i32, i32) {
    %c0_i32 = arith.constant 0 : i32
    %c0_i32_0 = arith.constant 0 : i32
    return %arg0, %c0_i32 : i32, i32
  }
}

</mosaic_0001>

<bundles_post_ra>
// kernel: classification_cnn2_forward.1
= control target key start
LH: loop header
LB: loop body
LE: loop exit
PB: predicated region body
PF: predicated region fallthrough
CT: control target
= control target key end

     0   :  { %12 = vsyncpa [#allocation3], 0  ;;  %s1258_s0 = inlined_call_operand.vmem [shape: bf16[8,128], index: 0, kind: input, shape index: {}]   ;;  %s1259_s1 = inlined_call_operand.hbm [shape: bf16[128,512], index: 1, kind: input, shape index: {}]   ;;  %s1260_s2 = inlined_call_operand.vmem [shape: f32[1,512], index: 2, kind: input, shape index: {}]   ;;  %s1261_s3 = inlined_call_operand.hbm [shape: bf16[512,128], index: 3, kind: input, shape index: {}]   ;;  %s1262_s4 = inlined_call_operand.vmem [shape: f32[1,128], index: 4, kind: input, shape index: {}]   ;;  %s1263_s5 = inlined_call_operand.hbm [shape: bf16[128,128], index: 5, kind: input, shape index: {}]   ;;  %s1264_s6 = inlined_call_operand.vmem [shape: f32[1,128], index: 6, kind: input, shape index: {}]   ;;  %s1265_s7 = inlined_call_operand.vmem [shape: f32[8,128], index: 7, kind: output, shape index: {}]  }
   0x1   :  { %13 = vsyncpa [#allocation5], 0  ;;  %s1151_s24 = smov [#allocation4]   ;;  %s1081_s28 = scalar_lea.hbm %s1261_s3, 4096 }
   0x2   :  { %s35_s25 = sshll.u32 %s1151_s24, 4  ;;  %p1082_p0 = scmp.ne.s32.totalorder %s1261_s3, %s1081_s28  ;;  %s36_s25 = int_to_ptr.vmem [resolvable:$true] %s35_s25 }
   0x3   :  { %p1085_p1 = scmp.lt.u32.totalorder %s1081_s28, %s1261_s3 }
   0x5   :  { %p1087_p2 = pnand %p1085_p1, %p1082_p0 }
   0x7   :  { %1090 = shalt.err (!%p1087_p2)
}
   0x8   :  { %s1091_s10 = scalar_lea.vmem %s36_s25, 4096  ;;  %p1096_p4 = scmp.lt.s32.totalorder %s36_s25, %s36_s25 }
   0x9   :  { %p1092_p3 = scmp.ne.s32.totalorder %s36_s25, %s1091_s10  ;;  %p1097_p5 = scmp.lt.s32.totalorder %s1091_s10, %s1091_s10 }
   0xb   :  { %p1098_p6 = por %p1097_p5, %p1096_p4 }
   0xd   :  { %p1099_p7 = pnand %p1098_p6, %p1092_p3 }
   0xf   :  { %1102 = shalt.err (!%p1099_p7)
}
  0x10   :  { %s1152_s11 = smov 64   ;;  %s1153_s12 = smov 4  }
  0x11   :  { %41 = dma.hbm_to_vmem [thread:$0]  %s1261_s3, 4096, %s36_s25, [#allocation5], %s1152_s11, %s1152_s11, %s1153_s12  }
  0x12   :  { %s1154_s15 = smov [#allocation2]   ;;  %s1103_s19 = scalar_lea.hbm %s1259_s1, 4096 }
  0x13   :  { %s21_s16 = sshll.u32 %s1154_s15, 4  ;;  %p1104_p8 = scmp.ne.s32.totalorder %s1259_s1, %s1103_s19  ;;  %s22_s16 = int_to_ptr.vmem [resolvable:$true] %s21_s16 }
  0x14   :  { %p1107_p9 = scmp.lt.u32.totalorder %s1103_s19, %s1259_s1 }
  0x16   :  { %p1109_p10 = pnand %p1107_p9, %p1104_p8 }
  0x18   :  { %1112 = shalt.err (!%p1109_p10)
}
  0x19   :  { %s1113_s24 = scalar_lea.vmem %s22_s16, 4096  ;;  %p1118_p12 = scmp.lt.s32.totalorder %s22_s16, %s22_s16 }
  0x1a   :  { %p1114_p11 = scmp.ne.s32.totalorder %s22_s16, %s1113_s24  ;;  %p1119_p13 = scmp.lt.s32.totalorder %s1113_s24, %s1113_s24 }
  0x1c   :  { %p1120_p0 = por %p1119_p13, %p1118_p12 }
  0x1e   :  { %p1121_p1 = pnand %p1120_p0, %p1114_p11 }
  0x20   :  { %1124 = shalt.err (!%p1121_p1)
}
  0x21   :  { %s1155_s3 = smov 256   ;;  %s1156_s25 = smov 16  }
  0x22   :  { %27 = dma.hbm_to_vmem [thread:$0]  %s1259_s1, 4096, %s22_s16, [#allocation3], %s1155_s3, %s1155_s3, %s1156_s25  }
  0x23   :  { %s1157_s28 = smov [#allocation6]   ;;  %s1125_s9 = scalar_lea.hbm %s1263_s5, 1024 }
  0x24   :  { %s49_s29 = sshll.u32 %s1157_s28, 4  ;;  %p1126_p2 = scmp.ne.s32.totalorder %s1263_s5, %s1125_s9  ;;  %s50_s29 = int_to_ptr.vmem [resolvable:$true] %s49_s29 }
  0x25   :  { %p1129_p3 = scmp.lt.u32.totalorder %s1125_s9, %s1263_s5 }
  0x27   :  { %p1131_p4 = pnand %p1129_p3, %p1126_p2 }
  0x29   :  { %1134 = shalt.err (!%p1131_p4)
}
  0x2a   :  { %s1135_s17 = scalar_lea.vmem %s50_s29, 1024  ;;  %p1140_p6 = scmp.lt.s32.totalorder %s50_s29, %s50_s29 }
  0x2b   :  { %p1136_p5 = scmp.ne.s32.totalorder %s50_s29, %s1135_s17  ;;  %p1141_p7 = scmp.lt.s32.totalorder %s1135_s17, %s1135_s17 }
  0x2d   :  { %p1142_p8 = por %p1141_p7, %p1140_p6 }
  0x2f   :  { %p1143_p9 = pnand %p1142_p8, %p1136_p5 }
  0x31   :  { %1146 = shalt.err (!%p1143_p9)
}
  0x32   :  { %55 = dma.hbm_to_vmem [thread:$0]  %s1263_s5, 1024, %s50_s29, [#allocation5], %s1152_s11, %s1152_s11, %s1153_s12  }
  0x33   :  { %1147 = dma.done.wait [#allocation3], 4096  }
  0x34   :  { %1148 = vsyncadd [#allocation3], 4294963200 }
  0x35   :  { %1149 = dma.done.wait [#allocation5], 5120  }
  0x36   :  { %1150 = vsyncadd [#allocation5], 4294962176  ;;  %v1158_v0 = vmov 0   ;;  %v993_v1 = vld [vmem:[#allocation2 + $0x4] ss:$16 sps:$4 sm:$0xff]   ;;  %v1045_v38 = vld [vmem:[#allocation4 + $0x48] sm:$0xff]  }
  0x37   :  { %315 = vmatprep.mubr.bf16.mxu0 %v1158_v0  ;;  %356 = vmatprep.mubr.bf16.mxu1 %v1158_v0  ;;  %v995_v2 = vld [vmem:[#allocation2 + $0xc] ss:$16 sps:$4 sm:$0xff]   ;;  %v997_v3 = vld [vmem:[#allocation2] ss:$16 sps:$4 sm:$0xff]   ;;  %v998_v4 = vld [vmem:[#allocation2 + $0x8] ss:$16 sps:$4 sm:$0xff]  }
  0x38   :  { %283 = vmatprep.subr.bf16.mxu0 %v993_v1  ;;  %324 = vmatprep.subr.bf16.mxu1 %v995_v2  ;;  %v999_v5 = vld [vmem:[#allocation2 + $0x24] ss:$16 sps:$4 sm:$0xff]   ;;  %v1001_v6 = vld [vmem:[#allocation2 + $0x2c] ss:$16 sps:$4 sm:$0xff]   ;;  %v1003_v7 = vld [vmem:[#allocation2 + $0x20] ss:$16 sps:$4 sm:$0xff]  }
  0x39   :  { %284 = vmatpush1.bf16.msra.mxu0 %v997_v3  ;;  %325 = vmatpush1.bf16.msra.mxu1 %v998_v4  ;;  %v1004_v8 = vld [vmem:[#allocation2 + $0x28] ss:$16 sps:$4 sm:$0xff]   ;;  %v1005_v9 = vld [vmem:[#allocation2 + $0x44] ss:$16 sps:$4 sm:$0xff]   ;;  %v1007_v10 = vld [vmem:[#allocation2 + $0x4c] ss:$16 sps:$4 sm:$0xff]   ;;  %v103_v3 = vlaneseq }
  0x3a   :  { %285 = vmatprep.subr.bf16.mxu0 %v999_v5  ;;  %326 = vmatprep.subr.bf16.mxu1 %v1001_v6  ;;  %v1009_v11 = vld [vmem:[#allocation2 + $0x40] ss:$16 sps:$4 sm:$0xff]   ;;  %v1010_v12 = vld [vmem:[#allocation2 + $0x48] ss:$16 sps:$4 sm:$0xff]   ;;  %v1011_v13 = vld [vmem:[#allocation2 + $0x64] ss:$16 sps:$4 sm:$0xff]  }
  0x3b   :  { %v1013_v14 = vld [vmem:[#allocation2 + $0x6c] ss:$16 sps:$4 sm:$0xff]   ;;  %v1015_v15 = vld [vmem:[#allocation2 + $0x60] ss:$16 sps:$4 sm:$0xff]   ;;  %v1016_v16 = vld [vmem:[#allocation2 + $0x68] ss:$16 sps:$4 sm:$0xff]  }
  0x3c   :  { %v1017_v17 = vld [vmem:[#allocation2 + $0x84] ss:$16 sps:$4 sm:$0xff]   ;;  %v1019_v18 = vld [vmem:[#allocation2 + $0x8c] ss:$16 sps:$4 sm:$0xff]   ;;  %v1021_v19 = vld [vmem:[#allocation2 + $0x80] ss:$16 sps:$4 sm:$0xff]  }
  0x3d   :  { %286 = vmatpush1.bf16.msra.mxu0 %v1003_v7  ;;  %327 = vmatpush1.bf16.msra.mxu1 %v1004_v8  ;;  %v1022_v20 = vld [vmem:[#allocation2 + $0x88] ss:$16 sps:$4 sm:$0xff]   ;;  %v1023_v21 = vld [vmem:[#allocation2 + $0xa4] ss:$16 sps:$4 sm:$0xff]   ;;  %v1025_v22 = vld [vmem:[#allocation2 + $0xac] ss:$16 sps:$4 sm:$0xff]  }
  0x3e   :  { %287 = vmatprep.subr.bf16.mxu0 %v1005_v9  ;;  %328 = vmatprep.subr.bf16.mxu1 %v1007_v10  ;;  %v1027_v23 = vld [vmem:[#allocation2 + $0xa0] ss:$16 sps:$4 sm:$0xff]   ;;  %v1028_v24 = vld [vmem:[#allocation2 + $0xa8] ss:$16 sps:$4 sm:$0xff]   ;;  %v1029_v25 = vld [vmem:[#allocation2 + $0xc4] ss:$16 sps:$4 sm:$0xff]  }
  0x3f   :  { %v1031_v26 = vld [vmem:[#allocation2 + $0xcc] ss:$16 sps:$4 sm:$0xff]   ;;  %v1033_v27 = vld [vmem:[#allocation2 + $0xc0] ss:$16 sps:$4 sm:$0xff]   ;;  %v1034_v28 = vld [vmem:[#allocation2 + $0xc8] ss:$16 sps:$4 sm:$0xff]  }
  0x40   :  { %v1035_v29 = vld [vmem:[#allocation2 + $0xe4] ss:$16 sps:$4 sm:$0xff]   ;;  %v1037_v30 = vld [vmem:[#allocation2 + $0xec] ss:$16 sps:$4 sm:$0xff]   ;;  %v1039_v31 = vld [vmem:[#allocation2 + $0xe0] ss:$16 sps:$4 sm:$0xff]  }
  0x41   :  { %288 = vmatpush1.bf16.msra.mxu0 %v1009_v11  ;;  %329 = vmatpush1.bf16.msra.mxu1 %v1010_v12  ;;  %v1040_v32 = vld [vmem:[#allocation2 + $0xe8] ss:$16 sps:$4 sm:$0xff]   ;;  %v1041_v33 = vld [vmem:[#allocation4 + $0x40] sm:$0xff]   ;;  %v1049_v42 = vld [vmem:[#allocation4 + $0x50] sm:$0xff]   ;;  %v1159_v2 = vmov 0.0   ;;  %v104_v4 = vshrl.u32 %v103_v3, 7 }
  0x42   :  { %289 = vmatprep.subr.bf16.mxu0 %v1011_v13  ;;  %330 = vmatprep.subr.bf16.mxu1 %v1013_v14  ;;  %v1042_v34 = vld [vmem:[#allocation4 + $0xc0] sm:$0xff]   ;;  %v1046_v39 = vld [vmem:[#allocation4 + $0xc8] sm:$0xff]   ;;  %v1050_v43 = vld [vmem:[#allocation4 + $0xd0] sm:$0xff]   ;;  %vm1160_vm0 = vmmov 0  }
  0x43   :  { %v68_v35 = vld [vmem:[%s1258_s0] sm:$0xf]  ;;  %v1047_v40 = vld [vmem:[#allocation4 + $0x8] sm:$0xff]   ;;  %v1051_v44 = vld [vmem:[#allocation4 + $0x10] sm:$0xff]   ;;  %v105_v5 = vsub.s32 0, %v104_v4  ;;  %v113_v6 = vsub.s32 2, %v104_v4 }
  0x44   :  { %v1043_v36 = vld [vmem:[#allocation4] sm:$0xff]   ;;  %v1048_v41 = vld [vmem:[#allocation4 + $0x88] sm:$0xff]   ;;  %v1052_v45 = vld [vmem:[#allocation4 + $0x90] sm:$0xff]   ;;  %v109_v8 = vsub.s32 1, %v104_v4  ;;  %v117_v9 = vsub.s32 3, %v104_v4 }
  0x45   :  { %290 = vmatpush1.bf16.msra.mxu0 %v1015_v15  ;;  %331 = vmatpush1.bf16.msra.mxu1 %v1016_v16  ;;  %v1044_v37 = vld [vmem:[#allocation4 + $0x80] sm:$0xff]   ;;  %v1053_v46 = vld [vmem:[#allocation4 + $0x58] sm:$0xff]   ;;  %v1061_v54 = vld [vmem:[#allocation4 + $0x68] sm:$0xff]  }
  0x46   :  { %291 = vmatprep.subr.bf16.mxu0 %v1017_v17  ;;  %332 = vmatprep.subr.bf16.mxu1 %v1019_v18  ;;  %v1054_v47 = vld [vmem:[#allocation4 + $0xd8] sm:$0xff]   ;;  %v1057_v50 = vld [vmem:[#allocation4 + $0x60] sm:$0xff]   ;;  %v1062_v55 = vld [vmem:[#allocation4 + $0xe8] sm:$0xff]  }
  0x47   :  { %v1055_v48 = vld [vmem:[#allocation4 + $0x18] sm:$0xff]   ;;  %v1058_v51 = vld [vmem:[#allocation4 + $0xe0] sm:$0xff]   ;;  %v1063_v56 = vld [vmem:[#allocation4 + $0x28] sm:$0xff]  }
  0x48   :  { %v1056_v49 = vld [vmem:[#allocation4 + $0x98] sm:$0xff]   ;;  %v1059_v52 = vld [vmem:[#allocation4 + $0x20] sm:$0xff]   ;;  %v1064_v57 = vld [vmem:[#allocation4 + $0xa8] sm:$0xff]  }
  0x49   :  { %292 = vmatpush1.bf16.msra.mxu0 %v1021_v19  ;;  %333 = vmatpush1.bf16.msra.mxu1 %v1022_v20  ;;  %v1060_v53 = vld [vmem:[#allocation4 + $0xa0] sm:$0xff]   ;;  %v1065_v58 = vld [vmem:[#allocation4 + $0x70] sm:$0xff]   ;;  %v1069_v62 = vld [vmem:[#allocation4 + $0x78] sm:$0xff]  }
  0x4a   :  { %293 = vmatprep.subr.bf16.mxu0 %v1023_v21  ;;  %334 = vmatprep.subr.bf16.mxu1 %v1025_v22  ;;  %v1066_v59 = vld [vmem:[#allocation4 + $0xf0] sm:$0xff]   ;;  %v1070_v63 = vld [vmem:[#allocation4 + $0xf8] sm:$0xff]   ;;  %v101_v7 = vld [vmem:[%s1260_s2] sm:$0xf] }
  0x4b   :  { %v1067_v60 = vld [vmem:[#allocation4 + $0x30] sm:$0xff]   ;;  %v1071_v0 = vld [vmem:[#allocation4 + $0x38] sm:$0xff]   ;;  %v106_v10 = vrot.slane %v101_v7, %v105_v5  ;;  %v114_v11 = vrot.slane %v101_v7, %v113_v6  ;;  %v110_v12 = vrot.slane %v101_v7, %v109_v8  ;;  %v118_v13 = vrot.slane %v101_v7, %v117_v9 }
  0x4c   :  { %v1068_v61 = vld [vmem:[#allocation4 + $0xb0] sm:$0xff]   ;;  %v1072_v1 = vld [vmem:[#allocation4 + $0xb8] sm:$0xff]  }
  0x4d   :  { %294 = vmatpush1.bf16.msra.mxu0 %v1027_v23  ;;  %335 = vmatpush1.bf16.msra.mxu1 %v1028_v24 }
  0x4e   :  { %295 = vmatprep.subr.bf16.mxu0 %v1029_v25  ;;  %336 = vmatprep.subr.bf16.mxu1 %v1031_v26 }
  0x51   :  { %296 = vmatpush1.bf16.msra.mxu0 %v1033_v27  ;;  %337 = vmatpush1.bf16.msra.mxu1 %v1034_v28 }
  0x52   :  { %297 = vmatprep.subr.bf16.mxu0 %v1035_v29  ;;  %338 = vmatprep.subr.bf16.mxu1 %v1037_v30 }
  0x55   :  { %298 = vmatpush1.bf16.msra.mxu0 %v1039_v31  ;;  %339 = vmatpush1.bf16.msra.mxu1 %v1040_v32 }
  0x56   :  { %910 = vmatprep.subr.bf16.mxu0 %v1041_v33  ;;  %932 = vmatprep.subr.bf16.mxu1 %v1042_v34  ;;  %v1073_v33 = vld [vmem:[#allocation6] sm:$0xff]  }
  0x58   :  { %316 = vmatmul.mubr.bf16.vlgmr.msra.gmra.mrb[0].mxu0 %v68_v35  ;;  %357 = vmatmul.mubr.bf16.vlgmr.msra.gmra.mrb[0].mxu1 %v68_v35  ;;  %v1074_v35 = vld [vmem:[#allocation6 + $0x8] sm:$0xff]  }
  0x59   :  { %911 = vmatpush3.bf16.msra.mxu0 %v1043_v36  ;;  %933 = vmatpush3.bf16.msra.mxu1 %v1044_v37  ;;  %v1075_v36 = vld [vmem:[#allocation6 + $0x10] sm:$0xff]   ;;  %v1076_v37 = vld [vmem:[#allocation6 + $0x18] sm:$0xff]  }
  0x5a   :  { %912 = vmatprep.subr.bf16.mxu0 %v1045_v38  ;;  %934 = vmatprep.subr.bf16.mxu1 %v1046_v39  ;;  %v1077_v38 = vld [vmem:[#allocation6 + $0x20] sm:$0xff]   ;;  %v1078_v39 = vld [vmem:[#allocation6 + $0x28] sm:$0xff]  }
  0x5d   :  { %913 = vmatpush3.bf16.msra.mxu0 %v1047_v40  ;;  %935 = vmatpush3.bf16.msra.mxu1 %v1048_v41  ;;  %v1079_v40 = vld [vmem:[#allocation6 + $0x30] sm:$0xff]   ;;  %v1080_v41 = vld [vmem:[#allocation6 + $0x38] sm:$0xff]  }
  0x5e   :  { %914 = vmatprep.subr.bf16.mxu0 %v1049_v42  ;;  %936 = vmatprep.subr.bf16.mxu1 %v1050_v43 }
  0x61   :  { %915 = vmatpush3.bf16.msra.mxu0 %v1051_v44  ;;  %937 = vmatpush3.bf16.msra.mxu1 %v1052_v45  ;;  %v868_v44 = vld [vmem:[%s1262_s4] ss:$0 sm:$0xff] }
  0x62   :  { %916 = vmatprep.subr.bf16.mxu0 %v1053_v46  ;;  %938 = vmatprep.subr.bf16.mxu1 %v1054_v47 }
  0x65   :  { %917 = vmatpush3.bf16.msra.mxu0 %v1055_v48  ;;  %939 = vmatpush3.bf16.msra.mxu1 %v1056_v49 }
  0x66   :  { %918 = vmatprep.subr.bf16.mxu0 %v1057_v50  ;;  %940 = vmatprep.subr.bf16.mxu1 %v1058_v51 }
  0x69   :  { %919 = vmatpush3.bf16.msra.mxu0 %v1059_v52  ;;  %941 = vmatpush3.bf16.msra.mxu1 %v1060_v53 }
  0x6a   :  { %920 = vmatprep.subr.bf16.mxu0 %v1061_v54  ;;  %942 = vmatprep.subr.bf16.mxu1 %v1062_v55 }
  0x6d   :  { %921 = vmatpush3.bf16.msra.mxu0 %v1063_v56  ;;  %943 = vmatpush3.bf16.msra.mxu1 %v1064_v57  ;;  %v901_v57 = vld [vmem:[%s1264_s6] ss:$0 sm:$0xff] }
  0x6e   :  { %922 = vmatprep.subr.bf16.mxu0 %v1065_v58  ;;  %944 = vmatprep.subr.bf16.mxu1 %v1066_v59 }
  0x71   :  { %923 = vmatpush3.bf16.msra.mxu0 %v1067_v60  ;;  %945 = vmatpush3.bf16.msra.mxu1 %v1068_v61 }
  0x72   :  { %924 = vmatprep.subr.bf16.mxu0 %v1069_v62  ;;  %946 = vmatprep.subr.bf16.mxu1 %v1070_v63 }
  0x75   :  { %925 = vmatpush3.bf16.msra.mxu0 %v1071_v0  ;;  %947 = vmatpush3.bf16.msra.mxu1 %v1072_v1 }
  0x76   :  { %963 = vmatprep.subr.bf16.mxu0 %v1159_v2 }
 0x12b   :  { %v317_v14 = vpop.f32.mrb[0].mxu0  ;;  %v358_v15 = vpop.f32.mrb[0].mxu1 }
 0x12c   :  { %v318_v16 = vadd.f32 %v317_v14, %v106_v10  ;;  %v359_v17 = vadd.f32 %v358_v15, %v114_v11  ;;  %v319_v18 = vpop.f32.mrb[1].mxu0  ;;  %v360_v19 = vpop.f32.mrb[1].mxu1 }
 0x12d   :  { %v320_v20 = vadd.f32 %v319_v18, %v110_v12  ;;  %v361_v21 = vadd.f32 %v360_v19, %v118_v13  ;;  %v321_v22 = vpop.f32.mrb[2].mxu0  ;;  %v362_v23 = vpop.f32.mrb[2].mxu1 }
 0x12e   :  { %v365_v24 = vmax.f32 %v318_v16, 0.0  ;;  %v367_v25 = vmax.f32 %v359_v17, 0.0  ;;  %v322_v26 = vpop.f32.mrb[3].mxu0  ;;  %v363_v27 = vpop.f32.mrb[3].mxu1 }
 0x12f   :  { %v366_v28 = vmax.f32 %v320_v20, 0.0  ;;  %v368_v29 = vmax.f32 %v361_v21, 0.0 }
 0x130   :  { %v371_v30 = vpack.c.bf16 %v367_v25, %v367_v25  ;;  %v369_v34 = vpack.c.bf16 %v365_v24, %v365_v24 }
 0x131   :  { %v370_v31 = vpack.c.bf16 %v366_v28, %v366_v28  ;;  %v372_v32 = vpack.c.bf16 %v368_v29, %v368_v29 }
 0x133   :  { %668 = vmatprep.mubr.bf16.mxu0 %v370_v31  ;;  %708 = vmatprep.mubr.bf16.mxu1 %v372_v32 }
 0x134   :  { %669 = vmatmul.mubr.bf16.vlgmr.msra.gmra.mrb[4].mxu0 %v369_v34  ;;  %709 = vmatmul.mubr.bf16.vlgmr.msra.gmra.mrb[4].mxu1 %v371_v30 }
 0x135   :  { %964 = vmatpush3.bf16.msra.mxu0 %v1073_v33  ;;  %979 = vmatprep.mubr.msk.bf16.mxu0 %vm1160_vm0, %v1159_v2 }
 0x136   :  { %965 = vmatprep.subr.bf16.mxu0 %v1159_v2 }
 0x139   :  { %966 = vmatpush3.bf16.msra.mxu0 %v1074_v35 }
 0x13a   :  { %967 = vmatprep.subr.bf16.mxu0 %v1159_v2 }
 0x13d   :  { %968 = vmatpush3.bf16.msra.mxu0 %v1075_v36 }
 0x13e   :  { %969 = vmatprep.subr.bf16.mxu0 %v1159_v2 }
 0x141   :  { %970 = vmatpush3.bf16.msra.mxu0 %v1076_v37 }
 0x142   :  { %971 = vmatprep.subr.bf16.mxu0 %v1159_v2 }
 0x145   :  { %972 = vmatpush3.bf16.msra.mxu0 %v1077_v38 }
 0x146   :  { %973 = vmatprep.subr.bf16.mxu0 %v1159_v2 }
 0x149   :  { %974 = vmatpush3.bf16.msra.mxu0 %v1078_v39 }
 0x14a   :  { %975 = vmatprep.subr.bf16.mxu0 %v1159_v2 }
 0x14d   :  { %976 = vmatpush3.bf16.msra.mxu0 %v1079_v40 }
 0x14e   :  { %977 = vmatprep.subr.bf16.mxu0 %v1159_v2 }
 0x151   :  { %978 = vmatpush3.bf16.msra.mxu0 %v1080_v41 }
 0x207   :  { %v926_v42 = vpop.f32.mrb[4].mxu0  ;;  %v948_v43 = vpop.f32.mrb[4].mxu1 }
 0x208   :  { %v927_v45 = vpop.f32.mrb[5].mxu0  ;;  %v949_v46 = vpop.f32.mrb[5].mxu1 }
 0x209   :  { %v928_v47 = vadd.f32 %v927_v45, %v926_v42  ;;  %v950_v48 = vadd.f32 %v949_v46, %v948_v43  ;;  %v929_v49 = vpop.f32.mrb[6].mxu0  ;;  %v951_v50 = vpop.f32.mrb[6].mxu1 }
 0x20a   :  { %v930_v51 = vpop.f32.mrb[7].mxu0  ;;  %v952_v52 = vpop.f32.mrb[7].mxu1 }
 0x20b   :  { %v671_v53 = vadd.f32 %v928_v47, %v868_v44 }
 0x20d   :  { %v711_v54 = vadd.f32 %v950_v48, %v671_v53 }
 0x20f   :  { %v716_v55 = vmax.f32 %v711_v54, 0.0 }
 0x211   :  { %v717_v56 = vpack.c.bf16 %v716_v55, %v716_v55 }
 0x213   :  { %980 = vmatmul.mubr.bf16.vlgmr.msra.gmra.mrb[8].mxu0 %v717_v56 }
 0x2e6   :  { %v823_v58 = vpop.f32.mrb[8].mxu0 }
 0x2e7   :  { %v824_v59 = vadd.f32 %v901_v57, %v823_v58  ;;  %v981_v60 = vpop.f32.mrb[9].mxu0 }
 0x2e8   :  { %v826_v61 = vpop.f32.mrb[10].mxu0 }
 0x2e9   :  { %829 = vst [vmem:[%s1265_s7] sm:$0xff] %v824_v59  ;;  %v982_v62 = vpop.f32.mrb[11].mxu0 }
 0x2ea   :  { %834 = vsyncpa [#allocation3], 1 }
 0x2eb   :  { %835 = vsyncpa [#allocation5], 1 }

// kernel: classification_cnn2_forward.1
= control target key start
LH: loop header
LB: loop body
LE: loop exit
PB: predicated region body
PF: predicated region fallthrough
CT: control target
= control target key end

     0   :  { %12 = vsyncpa [#allocation3], 0  ;;  %s1258_s0 = inlined_call_operand.vmem [shape: bf16[8,128], index: 0, kind: input, shape index: {}]   ;;  %s1259_s1 = inlined_call_operand.hbm [shape: bf16[128,512], index: 1, kind: input, shape index: {}]   ;;  %s1260_s2 = inlined_call_operand.vmem [shape: f32[1,512], index: 2, kind: input, shape index: {}]   ;;  %s1261_s3 = inlined_call_operand.hbm [shape: bf16[512,128], index: 3, kind: input, shape index: {}]   ;;  %s1262_s4 = inlined_call_operand.vmem [shape: f32[1,128], index: 4, kind: input, shape index: {}]   ;;  %s1263_s5 = inlined_call_operand.hbm [shape: bf16[128,128], index: 5, kind: input, shape index: {}]   ;;  %s1264_s6 = inlined_call_operand.vmem [shape: f32[1,128], index: 6, kind: input, shape index: {}]   ;;  %s1265_s7 = inlined_call_operand.vmem [shape: f32[8,128], index: 7, kind: output, shape index: {}]  }
   0x1   :  { %13 = vsyncpa [#allocation5], 0  ;;  %s1151_s24 = smov [#allocation4]   ;;  %s1081_s28 = scalar_lea.hbm %s1261_s3, 4096 }
   0x2   :  { %s35_s25 = sshll.u32 %s1151_s24, 4  ;;  %p1082_p0 = scmp.ne.s32.totalorder %s1261_s3, %s1081_s28  ;;  %s36_s25 = int_to_ptr.vmem [resolvable:$true] %s35_s25 }
   0x3   :  { %p1085_p1 = scmp.lt.u32.totalorder %s1081_s28, %s1261_s3 }
   0x5   :  { %p1087_p2 = pnand %p1085_p1, %p1082_p0 }
   0x7   :  { %1090 = shalt.err (!%p1087_p2)
}
   0x8   :  { %s1091_s10 = scalar_lea.vmem %s36_s25, 4096  ;;  %p1096_p4 = scmp.lt.s32.totalorder %s36_s25, %s36_s25 }
   0x9   :  { %p1092_p3 = scmp.ne.s32.totalorder %s36_s25, %s1091_s10  ;;  %p1097_p5 = scmp.lt.s32.totalorder %s1091_s10, %s1091_s10 }
   0xb   :  { %p1098_p6 = por %p1097_p5, %p1096_p4 }
   0xd   :  { %p1099_p7 = pnand %p1098_p6, %p1092_p3 }
   0xf   :  { %1102 = shalt.err (!%p1099_p7)
}
  0x10   :  { %s1152_s11 = smov 64   ;;  %s1153_s12 = smov 4  }
  0x11   :  { %41 = dma.hbm_to_vmem [thread:$0]  %s1261_s3, 4096, %s36_s25, [#allocation5], %s1152_s11, %s1152_s11, %s1153_s12  }
  0x12   :  { %s1154_s15 = smov [#allocation2]   ;;  %s1103_s19 = scalar_lea.hbm %s1259_s1, 4096 }
  0x13   :  { %s21_s16 = sshll.u32 %s1154_s15, 4  ;;  %p1104_p8 = scmp.ne.s32.totalorder %s1259_s1, %s1103_s19  ;;  %s22_s16 = int_to_ptr.vmem [resolvable:$true] %s21_s16 }
  0x14   :  { %p1107_p9 = scmp.lt.u32.totalorder %s1103_s19, %s1259_s1 }
  0x16   :  { %p1109_p10 = pnand %p1107_p9, %p1104_p8 }
  0x18   :  { %1112 = shalt.err (!%p1109_p10)
}
  0x19   :  { %s1113_s24 = scalar_lea.vmem %s22_s16, 4096  ;;  %p1118_p12 = scmp.lt.s32.totalorder %s22_s16, %s22_s16 }
  0x1a   :  { %p1114_p11 = scmp.ne.s32.totalorder %s22_s16, %s1113_s24  ;;  %p1119_p13 = scmp.lt.s32.totalorder %s1113_s24, %s1113_s24 }
  0x1c   :  { %p1120_p0 = por %p1119_p13, %p1118_p12 }
  0x1e   :  { %p1121_p1 = pnand %p1120_p0, %p1114_p11 }
  0x20   :  { %1124 = shalt.err (!%p1121_p1)
}
  0x21   :  { %s1155_s3 = smov 256   ;;  %s1156_s25 = smov 16  }
  0x22   :  { %27 = dma.hbm_to_vmem [thread:$0]  %s1259_s1, 4096, %s22_s16, [#allocation3], %s1155_s3, %s1155_s3, %s1156_s25  }
  0x23   :  { %s1157_s28 = smov [#allocation6]   ;;  %s1125_s9 = scalar_lea.hbm %s1263_s5, 1024 }
  0x24   :  { %s49_s29 = sshll.u32 %s1157_s28, 4  ;;  %p1126_p2 = scmp.ne.s32.totalorder %s1263_s5, %s1125_s9  ;;  %s50_s29 = int_to_ptr.vmem [resolvable:$true] %s49_s29 }
  0x25   :  { %p1129_p3 = scmp.lt.u32.totalorder %s1125_s9, %s1263_s5 }
  0x27   :  { %p1131_p4 = pnand %p1129_p3, %p1126_p2 }
  0x29   :  { %1134 = shalt.err (!%p1131_p4)
}
  0x2a   :  { %s1135_s17 = scalar_lea.vmem %s50_s29, 1024  ;;  %p1140_p6 = scmp.lt.s32.totalorder %s50_s29, %s50_s29 }
  0x2b   :  { %p1136_p5 = scmp.ne.s32.totalorder %s50_s29, %s1135_s17  ;;  %p1141_p7 = scmp.lt.s32.totalorder %s1135_s17, %s1135_s17 }
  0x2d   :  { %p1142_p8 = por %p1141_p7, %p1140_p6 }
  0x2f   :  { %p1143_p9 = pnand %p1142_p8, %p1136_p5 }
  0x31   :  { %1146 = shalt.err (!%p1143_p9)
}
  0x32   :  { %55 = dma.hbm_to_vmem [thread:$0]  %s1263_s5, 1024, %s50_s29, [#allocation5], %s1152_s11, %s1152_s11, %s1153_s12  }
  0x33   :  { %1147 = dma.done.wait [#allocation3], 4096  }
  0x34   :  { %1148 = vsyncadd [#allocation3], 4294963200 }
  0x35   :  { %1149 = dma.done.wait [#allocation5], 5120  }
  0x36   :  { %1150 = vsyncadd [#allocation5], 4294962176  ;;  %v1158_v0 = vmov 0   ;;  %v993_v1 = vld [vmem:[#allocation2 + $0x4] ss:$16 sps:$4 sm:$0xff]   ;;  %v1045_v38 = vld [vmem:[#allocation4 + $0x48] sm:$0xff]  }
  0x37   :  { %315 = vmatprep.mubr.bf16.mxu0 %v1158_v0  ;;  %356 = vmatprep.mubr.bf16.mxu1 %v1158_v0  ;;  %v995_v2 = vld [vmem:[#allocation2 + $0xc] ss:$16 sps:$4 sm:$0xff]   ;;  %v997_v3 = vld [vmem:[#allocation2] ss:$16 sps:$4 sm:$0xff]   ;;  %v998_v4 = vld [vmem:[#allocation2 + $0x8] ss:$16 sps:$4 sm:$0xff]  }
  0x38   :  { %283 = vmatprep.subr.bf16.mxu0 %v993_v1  ;;  %324 = vmatprep.subr.bf16.mxu1 %v995_v2  ;;  %v999_v5 = vld [vmem:[#allocation2 + $0x24] ss:$16 sps:$4 sm:$0xff]   ;;  %v1001_v6 = vld [vmem:[#allocation2 + $0x2c] ss:$16 sps:$4 sm:$0xff]   ;;  %v1003_v7 = vld [vmem:[#allocation2 + $0x20] ss:$16 sps:$4 sm:$0xff]  }
  0x39   :  { %284 = vmatpush1.bf16.msra.mxu0 %v997_v3  ;;  %325 = vmatpush1.bf16.msra.mxu1 %v998_v4  ;;  %v1004_v8 = vld [vmem:[#allocation2 + $0x28] ss:$16 sps:$4 sm:$0xff]   ;;  %v1005_v9 = vld [vmem:[#allocation2 + $0x44] ss:$16 sps:$4 sm:$0xff]   ;;  %v1007_v10 = vld [vmem:[#allocation2 + $0x4c] ss:$16 sps:$4 sm:$0xff]   ;;  %v103_v3 = vlaneseq }
  0x3a   :  { %285 = vmatprep.subr.bf16.mxu0 %v999_v5  ;;  %326 = vmatprep.subr.bf16.mxu1 %v1001_v6  ;;  %v1009_v11 = vld [vmem:[#allocation2 + $0x40] ss:$16 sps:$4 sm:$0xff]   ;;  %v1010_v12 = vld [vmem:[#allocation2 + $0x48] ss:$16 sps:$4 sm:$0xff]   ;;  %v1011_v13 = vld [vmem:[#allocation2 + $0x64] ss:$16 sps:$4 sm:$0xff]  }
  0x3b   :  { %v1013_v14 = vld [vmem:[#allocation2 + $0x6c] ss:$16 sps:$4 sm:$0xff]   ;;  %v1015_v15 = vld [vmem:[#allocation2 + $0x60] ss:$16 sps:$4 sm:$0xff]   ;;  %v1016_v16 = vld [vmem:[#allocation2 + $0x68] ss:$16 sps:$4 sm:$0xff]  }
  0x3c   :  { %v1017_v17 = vld [vmem:[#allocation2 + $0x84] ss:$16 sps:$4 sm:$0xff]   ;;  %v1019_v18 = vld [vmem:[#allocation2 + $0x8c] ss:$16 sps:$4 sm:$0xff]   ;;  %v1021_v19 = vld [vmem:[#allocation2 + $0x80] ss:$16 sps:$4 sm:$0xff]  }
  0x3d   :  { %286 = vmatpush1.bf16.msra.mxu0 %v1003_v7  ;;  %327 = vmatpush1.bf16.msra.mxu1 %v1004_v8  ;;  %v1022_v20 = vld [vmem:[#allocation2 + $0x88] ss:$16 sps:$4 sm:$0xff]   ;;  %v1023_v21 = vld [vmem:[#allocation2 + $0xa4] ss:$16 sps:$4 sm:$0xff]   ;;  %v1025_v22 = vld [vmem:[#allocation2 + $0xac] ss:$16 sps:$4 sm:$0xff]  }
  0x3e   :  { %287 = vmatprep.subr.bf16.mxu0 %v1005_v9  ;;  %328 = vmatprep.subr.bf16.mxu1 %v1007_v10  ;;  %v1027_v23 = vld [vmem:[#allocation2 + $0xa0] ss:$16 sps:$4 sm:$0xff]   ;;  %v1028_v24 = vld [vmem:[#allocation2 + $0xa8] ss:$16 sps:$4 sm:$0xff]   ;;  %v1029_v25 = vld [vmem:[#allocation2 + $0xc4] ss:$16 sps:$4 sm:$0xff]  }
  0x3f   :  { %v1031_v26 = vld [vmem:[#allocation2 + $0xcc] ss:$16 sps:$4 sm:$0xff]   ;;  %v1033_v27 = vld [vmem:[#allocation2 + $0xc0] ss:$16 sps:$4 sm:$0xff]   ;;  %v1034_v28 = vld [vmem:[#allocation2 + $0xc8] ss:$16 sps:$4 sm:$0xff]  }
  0x40   :  { %v1035_v29 = vld [vmem:[#allocation2 + $0xe4] ss:$16 sps:$4 sm:$0xff]   ;;  %v1037_v30 = vld [vmem:[#allocation2 + $0xec] ss:$16 sps:$4 sm:$0xff]   ;;  %v1039_v31 = vld [vmem:[#allocation2 + $0xe0] ss:$16 sps:$4 sm:$0xff]  }
  0x41   :  { %288 = vmatpush1.bf16.msra.mxu0 %v1009_v11  ;;  %329 = vmatpush1.bf16.msra.mxu1 %v1010_v12  ;;  %v1040_v32 = vld [vmem:[#allocation2 + $0xe8] ss:$16 sps:$4 sm:$0xff]   ;;  %v1041_v33 = vld [vmem:[#allocation4 + $0x40] sm:$0xff]   ;;  %v1049_v42 = vld [vmem:[#allocation4 + $0x50] sm:$0xff]   ;;  %v1159_v2 = vmov 0.0   ;;  %v104_v4 = vshrl.u32 %v103_v3, 7 }
  0x42   :  { %289 = vmatprep.subr.bf16.mxu0 %v1011_v13  ;;  %330 = vmatprep.subr.bf16.mxu1 %v1013_v14  ;;  %v1042_v34 = vld [vmem:[#allocation4 + $0xc0] sm:$0xff]   ;;  %v1046_v39 = vld [vmem:[#allocation4 + $0xc8] sm:$0xff]   ;;  %v1050_v43 = vld [vmem:[#allocation4 + $0xd0] sm:$0xff]   ;;  %vm1160_vm0 = vmmov 0  }
  0x43   :  { %v68_v35 = vld [vmem:[%s1258_s0] sm:$0xf]  ;;  %v1047_v40 = vld [vmem:[#allocation4 + $0x8] sm:$0xff]   ;;  %v1051_v44 = vld [vmem:[#allocation4 + $0x10] sm:$0xff]   ;;  %v105_v5 = vsub.s32 0, %v104_v4  ;;  %v113_v6 = vsub.s32 2, %v104_v4 }
  0x44   :  { %v1043_v36 = vld [vmem:[#allocation4] sm:$0xff]   ;;  %v1048_v41 = vld [vmem:[#allocation4 + $0x88] sm:$0xff]   ;;  %v1052_v45 = vld [vmem:[#allocation4 + $0x90] sm:$0xff]   ;;  %v109_v8 = vsub.s32 1, %v104_v4  ;;  %v117_v9 = vsub.s32 3, %v104_v4 }
  0x45   :  { %290 = vmatpush1.bf16.msra.mxu0 %v1015_v15  ;;  %331 = vmatpush1.bf16.msra.mxu1 %v1016_v16  ;;  %v1044_v37 = vld [vmem:[#allocation4 + $0x80] sm:$0xff]   ;;  %v1053_v46 = vld [vmem:[#allocation4 + $0x58] sm:$0xff]   ;;  %v1061_v54 = vld [vmem:[#allocation4 + $0x68] sm:$0xff]  }
  0x46   :  { %291 = vmatprep.subr.bf16.mxu0 %v1017_v17  ;;  %332 = vmatprep.subr.bf16.mxu1 %v1019_v18  ;;  %v1054_v47 = vld [vmem:[#allocation4 + $0xd8] sm:$0xff]   ;;  %v1057_v50 = vld [vmem:[#allocation4 + $0x60] sm:$0xff]   ;;  %v1062_v55 = vld [vmem:[#allocation4 + $0xe8] sm:$0xff]  }
  0x47   :  { %v1055_v48 = vld [vmem:[#allocation4 + $0x18] sm:$0xff]   ;;  %v1058_v51 = vld [vmem:[#allocation4 + $0xe0] sm:$0xff]   ;;  %v1063_v56 = vld [vmem:[#allocation4 + $0x28] sm:$0xff]  }
  0x48   :  { %v1056_v49 = vld [vmem:[#allocation4 + $0x98] sm:$0xff]   ;;  %v1059_v52 = vld [vmem:[#allocation4 + $0x20] sm:$0xff]   ;;  %v1064_v57 = vld [vmem:[#allocation4 + $0xa8] sm:$0xff]  }
  0x49   :  { %292 = vmatpush1.bf16.msra.mxu0 %v1021_v19  ;;  %333 = vmatpush1.bf16.msra.mxu1 %v1022_v20  ;;  %v1060_v53 = vld [vmem:[#allocation4 + $0xa0] sm:$0xff]   ;;  %v1065_v58 = vld [vmem:[#allocation4 + $0x70] sm:$0xff]   ;;  %v1069_v62 = vld [vmem:[#allocation4 + $0x78] sm:$0xff]  }
  0x4a   :  { %293 = vmatprep.subr.bf16.mxu0 %v1023_v21  ;;  %334 = vmatprep.subr.bf16.mxu1 %v1025_v22  ;;  %v1066_v59 = vld [vmem:[#allocation4 + $0xf0] sm:$0xff]   ;;  %v1070_v63 = vld [vmem:[#allocation4 + $0xf8] sm:$0xff]   ;;  %v101_v7 = vld [vmem:[%s1260_s2] sm:$0xf] }
  0x4b   :  { %v1067_v60 = vld [vmem:[#allocation4 + $0x30] sm:$0xff]   ;;  %v1071_v0 = vld [vmem:[#allocation4 + $0x38] sm:$0xff]   ;;  %v106_v10 = vrot.slane %v101_v7, %v105_v5  ;;  %v114_v11 = vrot.slane %v101_v7, %v113_v6  ;;  %v110_v12 = vrot.slane %v101_v7, %v109_v8  ;;  %v118_v13 = vrot.slane %v101_v7, %v117_v9 }
  0x4c   :  { %v1068_v61 = vld [vmem:[#allocation4 + $0xb0] sm:$0xff]   ;;  %v1072_v1 = vld [vmem:[#allocation4 + $0xb8] sm:$0xff]  }
  0x4d   :  { %294 = vmatpush1.bf16.msra.mxu0 %v1027_v23  ;;  %335 = vmatpush1.bf16.msra.mxu1 %v1028_v24 }
  0x4e   :  { %295 = vmatprep.subr.bf16.mxu0 %v1029_v25  ;;  %336 = vmatprep.subr.bf16.mxu1 %v1031_v26 }
  0x51   :  { %296 = vmatpush1.bf16.msra.mxu0 %v1033_v27  ;;  %337 = vmatpush1.bf16.msra.mxu1 %v1034_v28 }
  0x52   :  { %297 = vmatprep.subr.bf16.mxu0 %v1035_v29  ;;  %338 = vmatprep.subr.bf16.mxu1 %v1037_v30 }
  0x55   :  { %298 = vmatpush1.bf16.msra.mxu0 %v1039_v31  ;;  %339 = vmatpush1.bf16.msra.mxu1 %v1040_v32 }
  0x56   :  { %910 = vmatprep.subr.bf16.mxu0 %v1041_v33  ;;  %932 = vmatprep.subr.bf16.mxu1 %v1042_v34  ;;  %v1073_v33 = vld [vmem:[#allocation6] sm:$0xff]  }
  0x58   :  { %316 = vmatmul.mubr.bf16.vlgmr.msra.gmra.mrb[0].mxu0 %v68_v35  ;;  %357 = vmatmul.mubr.bf16.vlgmr.msra.gmra.mrb[0].mxu1 %v68_v35  ;;  %v1074_v35 = vld [vmem:[#allocation6 + $0x8] sm:$0xff]  }
  0x59   :  { %911 = vmatpush3.bf16.msra.mxu0 %v1043_v36  ;;  %933 = vmatpush3.bf16.msra.mxu1 %v1044_v37  ;;  %v1075_v36 = vld [vmem:[#allocation6 + $0x10] sm:$0xff]   ;;  %v1076_v37 = vld [vmem:[#allocation6 + $0x18] sm:$0xff]  }
  0x5a   :  { %912 = vmatprep.subr.bf16.mxu0 %v1045_v38  ;;  %934 = vmatprep.subr.bf16.mxu1 %v1046_v39  ;;  %v1077_v38 = vld [vmem:[#allocation6 + $0x20] sm:$0xff]   ;;  %v1078_v39 = vld [vmem:[#allocation6 + $0x28] sm:$0xff]  }
  0x5d   :  { %913 = vmatpush3.bf16.msra.mxu0 %v1047_v40  ;;  %935 = vmatpush3.bf16.msra.mxu1 %v1048_v41  ;;  %v1079_v40 = vld [vmem:[#allocation6 + $0x30] sm:$0xff]   ;;  %v1080_v41 = vld [vmem:[#allocation6 + $0x38] sm:$0xff]  }
  0x5e   :  { %914 = vmatprep.subr.bf16.mxu0 %v1049_v42  ;;  %936 = vmatprep.subr.bf16.mxu1 %v1050_v43 }
  0x61   :  { %915 = vmatpush3.bf16.msra.mxu0 %v1051_v44  ;;  %937 = vmatpush3.bf16.msra.mxu1 %v1052_v45  ;;  %v868_v44 = vld [vmem:[%s1262_s4] ss:$0 sm:$0xff] }
  0x62   :  { %916 = vmatprep.subr.bf16.mxu0 %v1053_v46  ;;  %938 = vmatprep.subr.bf16.mxu1 %v1054_v47 }
  0x65   :  { %917 = vmatpush3.bf16.msra.mxu0 %v1055_v48  ;;  %939 = vmatpush3.bf16.msra.mxu1 %v1056_v49 }
  0x66   :  { %918 = vmatprep.subr.bf16.mxu0 %v1057_v50  ;;  %940 = vmatprep.subr.bf16.mxu1 %v1058_v51 }
  0x69   :  { %919 = vmatpush3.bf16.msra.mxu0 %v1059_v52  ;;  %941 = vmatpush3.bf16.msra.mxu1 %v1060_v53 }
  0x6a   :  { %920 = vmatprep.subr.bf16.mxu0 %v1061_v54  ;;  %942 = vmatprep.subr.bf16.mxu1 %v1062_v55 }
  0x6d   :  { %921 = vmatpush3.bf16.msra.mxu0 %v1063_v56  ;;  %943 = vmatpush3.bf16.msra.mxu1 %v1064_v57  ;;  %v901_v57 = vld [vmem:[%s1264_s6] ss:$0 sm:$0xff] }
  0x6e   :  { %922 = vmatprep.subr.bf16.mxu0 %v1065_v58  ;;  %944 = vmatprep.subr.bf16.mxu1 %v1066_v59 }
  0x71   :  { %923 = vmatpush3.bf16.msra.mxu0 %v1067_v60  ;;  %945 = vmatpush3.bf16.msra.mxu1 %v1068_v61 }
  0x72   :  { %924 = vmatprep.subr.bf16.mxu0 %v1069_v62  ;;  %946 = vmatprep.subr.bf16.mxu1 %v1070_v63 }
  0x75   :  { %925 = vmatpush3.bf16.msra.mxu0 %v1071_v0  ;;  %947 = vmatpush3.bf16.msra.mxu1 %v1072_v1 }
  0x76   :  { %963 = vmatprep.subr.bf16.mxu0 %v1159_v2 }
 0x12b   :  { %v317_v14 = vpop.f32.mrb[0].mxu0  ;;  %v358_v15 = vpop.f32.mrb[0].mxu1 }
 0x12c   :  { %v318_v16 = vadd.f32 %v317_v14, %v106_v10  ;;  %v359_v17 = vadd.f32 %v358_v15, %v114_v11  ;;  %v319_v18 = vpop.f32.mrb[1].mxu0  ;;  %v360_v19 = vpop.f32.mrb[1].mxu1 }
 0x12d   :  { %v320_v20 = vadd.f32 %v319_v18, %v110_v12  ;;  %v361_v21 = vadd.f32 %v360_v19, %v118_v13  ;;  %v321_v22 = vpop.f32.mrb[2].mxu0  ;;  %v362_v23 = vpop.f32.mrb[2].mxu1 }
 0x12e   :  { %v365_v24 = vmax.f32 %v318_v16, 0.0  ;;  %v367_v25 = vmax.f32 %v359_v17, 0.0  ;;  %v322_v26 = vpop.f32.mrb[3].mxu0  ;;  %v363_v27 = vpop.f32.mrb[3].mxu1 }
 0x12f   :  { %v366_v28 = vmax.f32 %v320_v20, 0.0  ;;  %v368_v29 = vmax.f32 %v361_v21, 0.0 }
 0x130   :  { %v371_v30 = vpack.c.bf16 %v367_v25, %v367_v25  ;;  %v369_v34 = vpack.c.bf16 %v365_v24, %v365_v24 }
 0x131   :  { %v370_v31 = vpack.c.bf16 %v366_v28, %v366_v28  ;;  %v372_v32 = vpack.c.bf16 %v368_v29, %v368_v29 }
 0x133   :  { %668 = vmatprep.mubr.bf16.mxu0 %v370_v31  ;;  %708 = vmatprep.mubr.bf16.mxu1 %v372_v32 }
 0x134   :  { %669 = vmatmul.mubr.bf16.vlgmr.msra.gmra.mrb[4].mxu0 %v369_v34  ;;  %709 = vmatmul.mubr.bf16.vlgmr.msra.gmra.mrb[4].mxu1 %v371_v30 }
 0x135   :  { %964 = vmatpush3.bf16.msra.mxu0 %v1073_v33  ;;  %979 = vmatprep.mubr.msk.bf16.mxu0 %vm1160_vm0, %v1159_v2 }
 0x136   :  { %965 = vmatprep.subr.bf16.mxu0 %v1159_v2 }
 0x139   :  { %966 = vmatpush3.bf16.msra.mxu0 %v1074_v35 }
 0x13a   :  { %967 = vmatprep.subr.bf16.mxu0 %v1159_v2 }
 0x13d   :  { %968 = vmatpush3.bf16.msra.mxu0 %v1075_v36 }
 0x13e   :  { %969 = vmatprep.subr.bf16.mxu0 %v1159_v2 }
 0x141   :  { %970 = vmatpush3.bf16.msra.mxu0 %v1076_v37 }
 0x142   :  { %971 = vmatprep.subr.bf16.mxu0 %v1159_v2 }
 0x145   :  { %972 = vmatpush3.bf16.msra.mxu0 %v1077_v38 }
 0x146   :  { %973 = vmatprep.subr.bf16.mxu0 %v1159_v2 }
 0x149   :  { %974 = vmatpush3.bf16.msra.mxu0 %v1078_v39 }
 0x14a   :  { %975 = vmatprep.subr.bf16.mxu0 %v1159_v2 }
 0x14d   :  { %976 = vmatpush3.bf16.msra.mxu0 %v1079_v40 }
 0x14e   :  { %977 = vmatprep.subr.bf16.mxu0 %v1159_v2 }
 0x151   :  { %978 = vmatpush3.bf16.msra.mxu0 %v1080_v41 }
 0x207   :  { %v926_v42 = vpop.f32.mrb[4].mxu0  ;;  %v948_v43 = vpop.f32.mrb[4].mxu1 }
 0x208   :  { %v927_v45 = vpop.f32.mrb[5].mxu0  ;;  %v949_v46 = vpop.f32.mrb[5].mxu1 }
 0x209   :  { %v928_v47 = vadd.f32 %v927_v45, %v926_v42  ;;  %v950_v48 = vadd.f32 %v949_v46, %v948_v43  ;;  %v929_v49 = vpop.f32.mrb[6].mxu0  ;;  %v951_v50 = vpop.f32.mrb[6].mxu1 }
 0x20a   :  { %v930_v51 = vpop.f32.mrb[7].mxu0  ;;  %v952_v52 = vpop.f32.mrb[7].mxu1 }
 0x20b   :  { %v671_v53 = vadd.f32 %v928_v47, %v868_v44 }
 0x20d   :  { %v711_v54 = vadd.f32 %v950_v48, %v671_v53 }
 0x20f   :  { %v716_v55 = vmax.f32 %v711_v54, 0.0 }
 0x211   :  { %v717_v56 = vpack.c.bf16 %v716_v55, %v716_v55 }
 0x213   :  { %980 = vmatmul.mubr.bf16.vlgmr.msra.gmra.mrb[8].mxu0 %v717_v56 }
 0x2e6   :  { %v823_v58 = vpop.f32.mrb[8].mxu0 }
 0x2e7   :  { %v824_v59 = vadd.f32 %v901_v57, %v823_v58  ;;  %v981_v60 = vpop.f32.mrb[9].mxu0 }
 0x2e8   :  { %v826_v61 = vpop.f32.mrb[10].mxu0 }
 0x2e9   :  { %829 = vst [vmem:[%s1265_s7] sm:$0xff] %v824_v59  ;;  %v982_v62 = vpop.f32.mrb[11].mxu0 }
 0x2ea   :  { %834 = vsyncpa [#allocation3], 1 }
 0x2eb   :  { %835 = vsyncpa [#allocation5], 1 }

</bundles_post_ra>
